<compile_context>
chip_gen: v6e
topology: v6e:2x2x1
jax: 0.10.0
libtpu: 0.0.40
codegen_flags: <defaults>
</compile_context>

<pallas_src>
import jax
import jax.numpy as jnp
from jax.experimental import pallas as pl
from jax.experimental.pallas import tpu as pltpu


def outconv_kernel(x_ref, w_ref, b_ref, o_ref):
    # x_ref: (1, C_in,  TR, 128)  VMEM, spatial fully packed on sublanes+lanes
    # w_ref: (C_out, C_in)        SMEM (scalars)
    # b_ref: (C_out,)             SMEM (scalars)
    # o_ref: (1, C_out, TR, 128)  VMEM
    c_out, c_in = w_ref.shape

    # Each input channel is a fully packed (TR, 128) slab; load once, in f32.
    xk = [x_ref[0, k, :, :].astype(jnp.float32) for k in range(c_in)]

    # 1x1 conv == per-output-channel FMA over the c_in channels (+ bias).
    ys = []
    for c in range(c_out):
        acc = xk[0] * w_ref[c, 0] + b_ref[c]
        for k in range(1, c_in):
            acc = acc + xk[k] * w_ref[c, k]
        ys.append(acc)                           # (TR, 128), f32

    # Softmax2d == softmax over the channel axis at every pixel.
    m = ys[0]
    for c in range(1, c_out):
        m = jnp.maximum(m, ys[c])
    ps = [jnp.exp(y - m) for y in ys]
    denom = ps[0]
    for c in range(1, c_out):
        denom = denom + ps[c]
    inv = 1.0 / denom                            # EUP; hidden under the DMAs

    for c in range(c_out):
        o_ref[0, c, :, :] = (ps[c] * inv).astype(o_ref.dtype)


def _pick_tile_rows(rows, cap):
    """Largest legal tile height (rows of 128 lanes) that divides `rows`."""
    if rows <= cap:
        return rows                  # full-extent last-two-dims block: legal
    for d in range(cap - cap % 8, 7, -8):   # sublane rule: multiples of 8
        if rows % d == 0:
            return d
    return None


def outconv_forward(x_nchw, weight, bias, *, vmem_budget_bytes=8 * 1024 * 1024):
    """softmax2d(conv1x1(x)).  x_nchw: [B, C_in, H, W]; weight: [C_out, C_in]
    (1x1 kernel squeezed); bias: [C_out].  Returns [B, C_out, H, W]."""
    B, C_in, H, W = x_nchw.shape
    C_out = weight.shape[0]
    HW = H * W

    # Largest rows-of-128 tile such that (inputs + outputs, double-buffered,
    # f32) stay well inside the default scoped-VMEM limit on every chip.
    bytes_per_row = (C_in + C_out) * 128 * 4
    cap = max(8, (vmem_budget_bytes // (2 * bytes_per_row)) // 8 * 8)

    rows = (HW + 127) // 128
    tr = _pick_tile_rows(rows, cap)
    if tr is None:
        # No multiple-of-8 divisor <= cap: round rows up to a multiple of 8 so
        # a divisor (at worst 8) is guaranteed.
        rows = ((rows + 7) // 8) * 8
        tr = _pick_tile_rows(rows, cap)
    HW_pad = rows * 128

    # Free (contiguous) reshape: NCHW -> [B, C_in, H*W] -> [B, C_in, rows, 128].
    x3 = x_nchw.reshape(B, C_in, HW)
    if HW_pad != HW:
        # TODO(synk): ragged spatial tail (H*W not a multiple of 128) costs one
        # extra HBM pass through jnp.pad; padded pixels are sliced off below.
        x3 = jnp.pad(x3, ((0, 0), (0, 0), (0, HW_pad - HW)))
    x4 = x3.reshape(B, C_in, rows, 128)

    w = weight.astype(jnp.float32)   # (C_out, C_in) -> SMEM scalars
    b = bias.astype(jnp.float32)     # (C_out,)      -> SMEM scalars

    out4 = pl.pallas_call(
        outconv_kernel,
        out_shape=jax.ShapeDtypeStruct((B, C_out, rows, 128), x_nchw.dtype),
        grid=(B, rows // tr),
        in_specs=[
            pl.BlockSpec((1, C_in, tr, 128), lambda bi, j: (bi, 0, j, 0)),
            pl.BlockSpec(memory_space=pltpu.MemorySpace.SMEM),
            pl.BlockSpec(memory_space=pltpu.MemorySpace.SMEM),
        ],
        out_specs=pl.BlockSpec((1, C_out, tr, 128), lambda bi, j: (bi, 0, j, 0)),
        compiler_params=pltpu.CompilerParams(
            dimension_semantics=("parallel", "parallel")),
    )(x4, w, b)

    out3 = out4.reshape(B, C_out, HW_pad)
    if HW_pad != HW:
        out3 = out3[:, :, :HW]
    return out3.reshape(B, C_out, H, W)


if __name__ == "__main__":
    B, C_in, C_out, H, W = 2, 4, 3, 16, 16

    key = jax.random.PRNGKey(0)
    kx, kw, kb = jax.random.split(key, 3)

    x = jax.random.normal(kx, (B, C_in, H, W), dtype=jnp.float32)
    # nn.Conv2d(in_ch, out_ch, 1): weight [out_ch, in_ch, 1, 1] squeezed, bias [out_ch]
    weight = jax.random.normal(kw, (C_out, C_in), dtype=jnp.float32) * 0.1
    bias = jax.random.normal(kb, (C_out,), dtype=jnp.float32) * 0.1

    out = outconv_forward(x, weight, bias)
    jax.block_until_ready(out)

    # Sanity check against a pure-JAX reference.
    ref = jnp.einsum("bchw,oc->bohw", x, weight) + bias[None, :, None, None]
    ref = jax.nn.softmax(ref, axis=1)
    assert out.shape == (B, C_out, H, W)
    assert jnp.allclose(out, ref, atol=1e-4, rtol=1e-4), "mismatch vs reference"

    print("KERNEL_OK")
</pallas_src>

<mosaic_0001>
module attributes {stable_mosaic.version = 11 : i64} {
  func.func @outconv_kernel(%arg0: i32, %arg1: i32, %arg2: memref<1x4x2x128xf32, #tpu.memory_space<vmem>>, %arg3: memref<3x4xf32, #tpu.memory_space<smem>>, %arg4: memref<3xf32, #tpu.memory_space<smem>>, %arg5: memref<1x3x2x128xf32, #tpu.memory_space<vmem>>) attributes {dimension_semantics = [#tpu.dimension_semantics<parallel>, #tpu.dimension_semantics<parallel>], iteration_bounds = array<i64: 2, 1>, scalar_prefetch = 0 : i64, scratch_operands = 0 : i64, tpu.core_type = #tpu.core_type<tc>, window_params = [{transform_indices = @transform_0, window_bounds = array<i64: 1, 4, 2, 128>}, {transform_indices = @transform_1, window_bounds = array<i64: 3, 4>}, {transform_indices = @transform_2, window_bounds = array<i64: 3>}, {transform_indices = @transform_3, window_bounds = array<i64: 1, 3, 2, 128>}]} {
    %c0 = arith.constant 0 : index
    %c0_0 = arith.constant 0 : index
    %c0_1 = arith.constant 0 : index
    %c0_2 = arith.constant 0 : index
    %0 = vector.load %arg2[%c0, %c0_0, %c0_1, %c0_2] : memref<1x4x2x128xf32, #tpu.memory_space<vmem>>, vector<1x1x2x128xf32>
    %1 = vector.shape_cast %0 : vector<1x1x2x128xf32> to vector<2x128xf32>
    %c0_3 = arith.constant 0 : index
    %c1 = arith.constant 1 : index
    %c0_4 = arith.constant 0 : index
    %c0_5 = arith.constant 0 : index
    %2 = vector.load %arg2[%c0_3, %c1, %c0_4, %c0_5] : memref<1x4x2x128xf32, #tpu.memory_space<vmem>>, vector<1x1x2x128xf32>
    %3 = vector.shape_cast %2 : vector<1x1x2x128xf32> to vector<2x128xf32>
    %c0_6 = arith.constant 0 : index
    %c2 = arith.constant 2 : index
    %c0_7 = arith.constant 0 : index
    %c0_8 = arith.constant 0 : index
    %4 = vector.load %arg2[%c0_6, %c2, %c0_7, %c0_8] : memref<1x4x2x128xf32, #tpu.memory_space<vmem>>, vector<1x1x2x128xf32>
    %5 = vector.shape_cast %4 : vector<1x1x2x128xf32> to vector<2x128xf32>
    %c0_9 = arith.constant 0 : index
    %c3 = arith.constant 3 : index
    %c0_10 = arith.constant 0 : index
    %c0_11 = arith.constant 0 : index
    %6 = vector.load %arg2[%c0_9, %c3, %c0_10, %c0_11] : memref<1x4x2x128xf32, #tpu.memory_space<vmem>>, vector<1x1x2x128xf32>
    %7 = vector.shape_cast %6 : vector<1x1x2x128xf32> to vector<2x128xf32>
    %c0_12 = arith.constant 0 : index
    %c0_13 = arith.constant 0 : index
    %8 = memref.load %arg3[%c0_12, %c0_13] : memref<3x4xf32, #tpu.memory_space<smem>>
    %9 = vector.broadcast %8 : f32 to vector<2x128xf32>
    %10 = arith.mulf %1, %9 : vector<2x128xf32>
    %c0_14 = arith.constant 0 : index
    %11 = memref.load %arg4[%c0_14] : memref<3xf32, #tpu.memory_space<smem>>
    %12 = vector.broadcast %11 : f32 to vector<2x128xf32>
    %13 = arith.addf %10, %12 : vector<2x128xf32>
    %c0_15 = arith.constant 0 : index
    %c1_16 = arith.constant 1 : index
    %14 = memref.load %arg3[%c0_15, %c1_16] : memref<3x4xf32, #tpu.memory_space<smem>>
    %15 = vector.broadcast %14 : f32 to vector<2x128xf32>
    %16 = arith.mulf %3, %15 : vector<2x128xf32>
    %17 = arith.addf %13, %16 : vector<2x128xf32>
    %c0_17 = arith.constant 0 : index
    %c2_18 = arith.constant 2 : index
    %18 = memref.load %arg3[%c0_17, %c2_18] : memref<3x4xf32, #tpu.memory_space<smem>>
    %19 = vector.broadcast %18 : f32 to vector<2x128xf32>
    %20 = arith.mulf %5, %19 : vector<2x128xf32>
    %21 = arith.addf %17, %20 : vector<2x128xf32>
    %c0_19 = arith.constant 0 : index
    %c3_20 = arith.constant 3 : index
    %22 = memref.load %arg3[%c0_19, %c3_20] : memref<3x4xf32, #tpu.memory_space<smem>>
    %23 = vector.broadcast %22 : f32 to vector<2x128xf32>
    %24 = arith.mulf %7, %23 : vector<2x128xf32>
    %25 = arith.addf %21, %24 : vector<2x128xf32>
    %c1_21 = arith.constant 1 : index
    %c0_22 = arith.constant 0 : index
    %26 = memref.load %arg3[%c1_21, %c0_22] : memref<3x4xf32, #tpu.memory_space<smem>>
    %27 = vector.broadcast %26 : f32 to vector<2x128xf32>
    %28 = arith.mulf %1, %27 : vector<2x128xf32>
    %c1_23 = arith.constant 1 : index
    %29 = memref.load %arg4[%c1_23] : memref<3xf32, #tpu.memory_space<smem>>
    %30 = vector.broadcast %29 : f32 to vector<2x128xf32>
    %31 = arith.addf %28, %30 : vector<2x128xf32>
    %c1_24 = arith.constant 1 : index
    %c1_25 = arith.constant 1 : index
    %32 = memref.load %arg3[%c1_24, %c1_25] : memref<3x4xf32, #tpu.memory_space<smem>>
    %33 = vector.broadcast %32 : f32 to vector<2x128xf32>
    %34 = arith.mulf %3, %33 : vector<2x128xf32>
    %35 = arith.addf %31, %34 : vector<2x128xf32>
    %c1_26 = arith.constant 1 : index
    %c2_27 = arith.constant 2 : index
    %36 = memref.load %arg3[%c1_26, %c2_27] : memref<3x4xf32, #tpu.memory_space<smem>>
    %37 = vector.broadcast %36 : f32 to vector<2x128xf32>
    %38 = arith.mulf %5, %37 : vector<2x128xf32>
    %39 = arith.addf %35, %38 : vector<2x128xf32>
    %c1_28 = arith.constant 1 : index
    %c3_29 = arith.constant 3 : index
    %40 = memref.load %arg3[%c1_28, %c3_29] : memref<3x4xf32, #tpu.memory_space<smem>>
    %41 = vector.broadcast %40 : f32 to vector<2x128xf32>
    %42 = arith.mulf %7, %41 : vector<2x128xf32>
    %43 = arith.addf %39, %42 : vector<2x128xf32>
    %c2_30 = arith.constant 2 : index
    %c0_31 = arith.constant 0 : index
    %44 = memref.load %arg3[%c2_30, %c0_31] : memref<3x4xf32, #tpu.memory_space<smem>>
    %45 = vector.broadcast %44 : f32 to vector<2x128xf32>
    %46 = arith.mulf %1, %45 : vector<2x128xf32>
    %c2_32 = arith.constant 2 : index
    %47 = memref.load %arg4[%c2_32] : memref<3xf32, #tpu.memory_space<smem>>
    %48 = vector.broadcast %47 : f32 to vector<2x128xf32>
    %49 = arith.addf %46, %48 : vector<2x128xf32>
    %c2_33 = arith.constant 2 : index
    %c1_34 = arith.constant 1 : index
    %50 = memref.load %arg3[%c2_33, %c1_34] : memref<3x4xf32, #tpu.memory_space<smem>>
    %51 = vector.broadcast %50 : f32 to vector<2x128xf32>
    %52 = arith.mulf %3, %51 : vector<2x128xf32>
    %53 = arith.addf %49, %52 : vector<2x128xf32>
    %c2_35 = arith.constant 2 : index
    %c2_36 = arith.constant 2 : index
    %54 = memref.load %arg3[%c2_35, %c2_36] : memref<3x4xf32, #tpu.memory_space<smem>>
    %55 = vector.broadcast %54 : f32 to vector<2x128xf32>
    %56 = arith.mulf %5, %55 : vector<2x128xf32>
    %57 = arith.addf %53, %56 : vector<2x128xf32>
    %c2_37 = arith.constant 2 : index
    %c3_38 = arith.constant 3 : index
    %58 = memref.load %arg3[%c2_37, %c3_38] : memref<3x4xf32, #tpu.memory_space<smem>>
    %59 = vector.broadcast %58 : f32 to vector<2x128xf32>
    %60 = arith.mulf %7, %59 : vector<2x128xf32>
    %61 = arith.addf %57, %60 : vector<2x128xf32>
    %62 = arith.maximumf %25, %43 : vector<2x128xf32>
    %63 = arith.maximumf %62, %61 : vector<2x128xf32>
    %64 = arith.subf %25, %63 : vector<2x128xf32>
    %65 = math.exp %64 : vector<2x128xf32>
    %66 = arith.subf %43, %63 : vector<2x128xf32>
    %67 = math.exp %66 : vector<2x128xf32>
    %68 = arith.subf %61, %63 : vector<2x128xf32>
    %69 = math.exp %68 : vector<2x128xf32>
    %70 = arith.addf %65, %67 : vector<2x128xf32>
    %71 = arith.addf %70, %69 : vector<2x128xf32>
    %cst = arith.constant 1.000000e+00 : f32
    %72 = vector.broadcast %cst : f32 to vector<2x128xf32>
    %73 = arith.divf %72, %71 : vector<2x128xf32>
    %74 = arith.mulf %65, %73 : vector<2x128xf32>
    %c0_39 = arith.constant 0 : index
    %c0_40 = arith.constant 0 : index
    %c0_41 = arith.constant 0 : index
    %c0_42 = arith.constant 0 : index
    %75 = vector.load %arg5[%c0_39, %c0_40, %c0_41, %c0_42] : memref<1x3x2x128xf32, #tpu.memory_space<vmem>>, vector<1x1x2x128xf32>
    %76 = vector.shape_cast %75 : vector<1x1x2x128xf32> to vector<2x128xf32>
    %77 = vector.shape_cast %74 : vector<2x128xf32> to vector<1x1x2x128xf32>
    tpu.vector_store %arg5[%c0_39, %c0_40, %c0_41, %c0_42], %77 {strides = array<i32>} : memref<1x3x2x128xf32, #tpu.memory_space<vmem>>, vector<1x1x2x128xf32>,
    %78 = arith.mulf %67, %73 : vector<2x128xf32>
    %c0_43 = arith.constant 0 : index
    %c1_44 = arith.constant 1 : index
    %c0_45 = arith.constant 0 : index
    %c0_46 = arith.constant 0 : index
    %79 = vector.load %arg5[%c0_43, %c1_44, %c0_45, %c0_46] : memref<1x3x2x128xf32, #tpu.memory_space<vmem>>, vector<1x1x2x128xf32>
    %80 = vector.shape_cast %79 : vector<1x1x2x128xf32> to vector<2x128xf32>
    %81 = vector.shape_cast %78 : vector<2x128xf32> to vector<1x1x2x128xf32>
    tpu.vector_store %arg5[%c0_43, %c1_44, %c0_45, %c0_46], %81 {strides = array<i32>} : memref<1x3x2x128xf32, #tpu.memory_space<vmem>>, vector<1x1x2x128xf32>,
    %82 = arith.mulf %69, %73 : vector<2x128xf32>
    %c0_47 = arith.constant 0 : index
    %c2_48 = arith.constant 2 : index
    %c0_49 = arith.constant 0 : index
    %c0_50 = arith.constant 0 : index
    %83 = vector.load %arg5[%c0_47, %c2_48, %c0_49, %c0_50] : memref<1x3x2x128xf32, #tpu.memory_space<vmem>>, vector<1x1x2x128xf32>
    %84 = vector.shape_cast %83 : vector<1x1x2x128xf32> to vector<2x128xf32>
    %85 = vector.shape_cast %82 : vector<2x128xf32> to vector<1x1x2x128xf32>
    tpu.vector_store %arg5[%c0_47, %c2_48, %c0_49, %c0_50], %85 {strides = array<i32>} : memref<1x3x2x128xf32, #tpu.memory_space<vmem>>, vector<1x1x2x128xf32>,
    return
  }
  func.func @transform_0(%arg0: i32, %arg1: i32) -> (i32, i32, i32, i32) {
    %c0_i32 = arith.constant 0 : i32
    %c0_i32_0 = arith.constant 0 : i32
    %c0_i32_1 = arith.constant 0 : i32
    return %arg0, %c0_i32, %arg1, %c0_i32_0 : i32, i32, i32, i32
  }
  func.func @transform_1(%arg0: i32, %arg1: i32) -> (i32, i32) {
    %c0_i32 = arith.constant 0 : i32
    %c0_i32_0 = arith.constant 0 : i32
    %c0_i32_1 = arith.constant 0 : i32
    return %c0_i32, %c0_i32_0 : i32, i32
  }
  func.func @transform_2(%arg0: i32, %arg1: i32) -> i32 {
    %c0_i32 = arith.constant 0 : i32
    %c0_i32_0 = arith.constant 0 : i32
    return %c0_i32 : i32
  }
  func.func @transform_3(%arg0: i32, %arg1: i32) -> (i32, i32, i32, i32) {
    %c0_i32 = arith.constant 0 : i32
    %c0_i32_0 = arith.constant 0 : i32
    %c0_i32_1 = arith.constant 0 : i32
    return %arg0, %c0_i32, %arg1, %c0_i32_0 : i32, i32, i32, i32
  }
}

</mosaic_0001>

<bundles_post_ra>
// kernel: tpu_custom_call.1
= control target key start
LH: loop header
LB: loop body
LE: loop exit
PB: predicated region body
PF: predicated region fallthrough
CT: control target
= control target key end

     0   :  { %s933_s0 = inlined_call_operand.hbm [shape: f32[2,4,2,128], index: 0, kind: input, shape index: {}]   ;;  %s934_s1 = inlined_call_operand.hbm [shape: f32[3,4], index: 1, kind: input, shape index: {}]   ;;  %s935_s2 = inlined_call_operand.vmem [shape: f32[3], index: 2, kind: input, shape index: {}]   ;;  %s936_s3 = inlined_call_operand.hbm [shape: f32[2,3,2,128], index: 3, kind: output, shape index: {}]  }
   0x1   :  { %938 = sst [smem:[#allocation14_spill]] %s934_s1 }
   0x2   :  { %8 = vsyncpa [#allocation3], 0 }
   0x3   :  { %10 = vsyncpa [#allocation3 + $0x1], 0 }
   0x4   :  { %11 = vsyncpa [#allocation5], 0 }
   0x5   :  { %12 = vsyncpa [#allocation6], 0 }
   0x6   :  { %13 = vsyncpa [#allocation4], 0 }
   0x7   :  { %15 = vsyncpa [#allocation4 + $0x1], 0  ;;  %s743_s12 = smov 0   ;;  %s745_s13 = smov 0  }
   0x8   :  { %s747_s14 = smov 0   ;;  %s749_s15 = smov 0  }
   0x9   :  { %s751_s16 = smov 0   ;;  %s753_s17 = smov 0  }
   0xa LB: > { %s439_s18 = sadd.s32 4294967295, %s713_s17   ;;  %s440_s19 = sadd.s32 4294967294, %s713_s17   ;;  %s713_s17 = sphi %s753_s17, %s21_s17   ;;  %s709_s16 = sphi %s751_s16, %s954_s16   ;;  %s705_s15 = sphi %s749_s15, %s953_s15   ;;  %s701_s14 = sphi %s747_s14, %s952_s14   ;;  %s697_s13 = sphi %s745_s13, %s951_s13   ;;  %s693_s12 = sphi %s743_s12, %s950_s12  }
   0xb   : > { %s42_s20 = sadd.s32 1, %s701_s14  ;;  %p49_p0 = scmp.ne.s32.totalorder %s701_s14, %s697_s13 }
   0xc   : > { %p50_p1 = scmp.eq.s32.totalorder %s713_s17, 0  ;;  %p55_p2 = scmp.ne.s32.totalorder %s697_s13, %s693_s12 }
   0xd   : > { %p781_p3 = scmp.eq.s32.totalorder %s439_s18, 0  ;;  %p123_p4 = scmp.eq.s32.totalorder %s439_s18, 1 }
   0xe   : > { %p51_p5 = por %p50_p1, %p49_p0  ;;  %p129_p6 = scmp.eq.s32.totalorder %s440_s19, 1 }
   0xf   : > { %p787_p7 = por %p781_p3, %p55_p2  ;;  %p791_p8 = por %p123_p4, %p49_p0 }
  0x10   : > { %p795_p9 = por %p129_p6, %p55_p2  ;;  %p441_p10 = scmp.ge.s32.totalorder %s713_s17, 1 }
  0x11   : > { %s941_s23 = scalar_select %p791_p8, 1, 0 }
  0x12   : > { %s942_s24 = scalar_select %p795_p9, 1, 0 }
  0x13   : > { %p136_p11 = scmp.lt.s32.totalorder %s713_s17, 3  ;;  %p505_p1 = scmp.lt.s32.totalorder %s713_s17, 2 }
  0x14   : > { %s158_s28 = sshll.u32 %s935_s2, 4  ;;  %s169_s4 = sand.u32 1, %s701_s14   ;;  %s159_s28 = int_to_ptr.vmem [resolvable:$true] %s158_s28 }
  0x15   : > { %p802_p13 = pnand %p441_p10, %p136_p11  ;;  %p812_p4 = pnand %p505_p1, %p51_p5 }
  0x16   : > { %s33_s5 = sadd.s32 1, %s709_s16  ;;  %s715_s6 = smov [#allocation7]  }
  0x17   : > { %p488_p0 = pneg %p802_p13  ;;  %s946_s1 = sld [smem:[#allocation14_spill]] }
  0x18   : > { %s582_s9 = scalar_lea.vmem %s159_s28, 16  ;;  %p590_p1 = scmp.lt.s32.totalorder %s159_s28, %s159_s28 }
  0x19   : > { %p818_p2 = pnand %p488_p0, %p781_p3  ;;  %p583_p5 = scmp.ne.s32.totalorder %s159_s28, %s582_s9 }
  0x1a   : > { %p591_p0 = scmp.lt.s32.totalorder %s582_s9, %s582_s9 }
  0x1b   : > { %p584_p6 = pneg %p818_p2 }
  0x1c   : > { %p592_p12 = por %p591_p0, %p590_p1 }
  0x1d   : > { %491 = dma.hbm_to_smem (!%p818_p2), %s946_s1, 64, %s715_s6, [#allocation5]  }
  0x1e   : > { %p585_p10 = pnand %p584_p6, %p583_p5 }
  0x20   : > { %p586_p11 = pneg %p585_p10 }
  0x22   : > { %p593_p9 = pnand %p592_p12, %p586_p11 }
  0x24   : > { %596 = shalt.err (!%p593_p9)
}
  0x25   : > { %s716_s10 = smov [#allocation8]   ;;  %p35_p8 = scmp.ge.s32.totalorder %s33_s5, 2 }
  0x26   : > { %494 = dma.vmem_to_smem (!%p818_p2), %s159_s28, 16, %s716_s10, [#allocation6]  }
  0x27   : > { %s445_s11 = sshll.u32 %s169_s4, 3  ;;  %s473_s18 = sshll.u32 %s709_s16, 7 }
  0x28   : > { %s956_s5 = smov (%p35_p8, %s33_s5), 0  ;;  %s180_s27 = scalar_lea.hbm %s933_s0, %s473_s18 }
  0x29   : > { %s37_s6 = ssub.s32 %s709_s16, %s956_s5  ;;  %s173_s7 = scalar_lea.vmem [#allocation2], %s445_s11 }
  0x2a   : > { %s181_s8 = sshll.u32 %s173_s7, 4  ;;  %p40_p9 = scmp.eq.s32.totalorder %s37_s6, 0  ;;  %s182_s8 = int_to_ptr.vmem [resolvable:$true] %s181_s8 }
  0x2b   : > { %s170_s9 = scalar_lea.sflag [#allocation3], %s169_s4  ;;  %p599_p12 = pneg %p812_p4 }
  0x2c   : > { %s844_s30 = scalar_select %p40_p9, %s701_s14, %s42_s20  }
  0x2d   : > { %s610_s28 = scalar_lea.vmem %s182_s8, 128  ;;  %s717_s10 = smov [#allocation2]  }
  0x2e   : > { %p611_p2 = scmp.ne.s32.totalorder %s182_s8, %s610_s28  ;;  %s615_s1 = sshll.u32 %s717_s10, 4  ;;  %s616_s1 = int_to_ptr.vmem [resolvable:$false] %s615_s1 }
  0x2f   : > { %s617_s19 = scalar_lea.vmem %s616_s1, 256  ;;  %p618_p6 = scmp.lt.s32.totalorder %s182_s8, %s616_s1 }
  0x30   : > { %p613_p8 = pnand %p611_p2, %p599_p12  ;;  %p619_p10 = scmp.lt.s32.totalorder %s617_s19, %s610_s28 }
  0x32   : > { %p614_p5 = pneg %p613_p8  ;;  %p620_p11 = por %p619_p10, %p618_p6 }
  0x34   : > { %p621_p1 = pnand %p620_p11, %p614_p5 }
  0x36   : > { %624 = shalt.err (!%p621_p1)
}
  0x37   : > { %s718_s11 = smov 32   ;;  %s719_s20 = smov 2  }
  0x38   : > { %498 = dma.hbm_to_vmem [thread:$0]  (!%p812_p4), %s180_s27, 128, %s182_s8, %s170_s9, %s718_s11, %s718_s11, %s719_s20  }
  0x39   : > { %193 = sbr.rel (%p802_p13) target bundleno = 152 (0x98), region = 32  ;;  %s853_s4 = sand.u32 (!%p802_p13), 1, %s697_s13  }
  0x3a   : > { %s449_s18 = sshll.u32 (!%p802_p13), %s853_s4, 3  ;;  %s196_s1 = scalar_lea.sflag (!%p802_p13), [#allocation3], %s853_s4 }
  0x3b   : > { %s857_s26 = scalar_lea.vmem (!%p802_p13), [#allocation2], %s449_s18 }
  0x3e   : > { %676 = dma.done.wait (%p787_p7), %s196_s1, 128  }
  0x3f   : > { %678 = vsyncadd (%p787_p7), %s196_s1, 4294967168 }
  0x40   : > { %680 = dma.done.wait (%p781_p3), [#allocation5], 64  }
  0x41   : > { %682 = vsyncadd (%p781_p3), [#allocation5], 4294967232 }
  0x42   : > { %684 = dma.done.wait (%p781_p3), [#allocation6], 16  }
  0x43   : > { %686 = vsyncadd (%p781_p3), [#allocation6], 4294967280 }
  0x44   : > { %212 = sfence }
  0x45   : > { %s238_s25 = sld [smem:[#allocation7]]  ;;  %v231_v0 = vld [vmem:[%s857_s26] sm:$0x3]  ;;  %v452_v1 = vld [vmem:[%s857_s26 + $0x2] sm:$0x3]  ;;  %s474_s1 = smul.u32 6, %s853_s4 }
  0x46   : > { %s241_s29 = sld [smem:[#allocation8]]  ;;  %v453_v5 = vld [vmem:[%s857_s26 + $0x4] sm:$0x3]  ;;  %v454_v13 = vld [vmem:[%s857_s26 + $0x6] sm:$0x3]  ;;  %p947_p7 = scmp.ne.s32.totalorder %s941_s23, 0 }
  0x47   : > { %s455_s22 = sld [smem:[#allocation7 + $0x1]]  ;;  %s230_s26 = scalar_lea.vmem [#allocation9], %s474_s1 }
  0x48   : > { %s456_s27 = sld [smem:[#allocation7 + $0x2]] }
  0x49   : > { %s872_s6 = sld [smem:[#allocation7 + $0x3]] }
  0x4a   : > { %s458_s7 = sld [smem:[#allocation7 + $0x80]] }
  0x4b   : > { %v239_v2 = vstv %s238_s25  ;;  %s459_s8 = sld [smem:[#allocation8 + $0x1]]  ;;  %s330_s25 = sshll.u32 %s230_s26, 4  ;;  %s880_s25 = int_to_ptr.vmem [resolvable:$true] %s330_s25 }
  0x4c   : > { %v240_v3 = vmul.f32 %v239_v2, %v231_v0  ;;  %v242_v4 = vstv %s241_s29  ;;  %s460_s21 = sld [smem:[#allocation7 + $0x81]]  ;;  %s475_s29 = smul.u32 96, %s705_s15 }
  0x4d   : > { %v245_v6 = vstv %s455_s22  ;;  %s461_s9 = sld [smem:[#allocation7 + $0x82]]  ;;  %s720_s15 = smov [#allocation9]  }
  0x4e   : > { %v243_v7 = vadd.f32 %v242_v4, %v240_v3  ;;  %v246_v8 = vmul.f32 %v452_v1, %v245_v6  ;;  %v249_v9 = vstv %s456_s27  ;;  %s462_s28 = sld [smem:[#allocation7 + $0x83]] }
  0x4f   : > { %s463_s10 = sld [smem:[#allocation7 + $0x100]]  ;;  %v250_v11 = vmul.f32 %v453_v5, %v249_v9  ;;  %v253_v14 = vstv %s872_s6  ;;  %s885_s6 = scalar_lea.hbm %s936_s3, %s475_s29 }
  0x50   : > { %v247_v10 = vadd.f32 %v246_v8, %v243_v7  ;;  %v257_v12 = vstv %s458_s7  ;;  %s464_s19 = sld [smem:[#allocation8 + $0x2]]  ;;  %v254_v22 = vmul.f32 %v454_v13, %v253_v14  ;;  %s316_s7 = scalar_lea.sflag [#allocation4], %s853_s4 }
  0x51   : > { %v258_v15 = vmul.f32 %v257_v12, %v231_v0  ;;  %v260_v16 = vstv %s459_s8  ;;  %s465_s11 = sld [smem:[#allocation7 + $0x101]]  ;;  %s625_s8 = scalar_lea.vmem %s880_s25, 96 }
  0x52   : > { %v263_v17 = vstv %s460_s21  ;;  %s466_s20 = sld [smem:[#allocation7 + $0x102]]  ;;  %v251_v21 = vadd.f32 %v250_v11, %v247_v10  ;;  %p626_p3 = scmp.ne.s32.totalorder %s880_s25, %s625_s8 }
  0x53   : > { %v261_v18 = vadd.f32 %v260_v16, %v258_v15  ;;  %v264_v19 = vmul.f32 %v452_v1, %v263_v17  ;;  %v267_v20 = vstv %s461_s9  ;;  %s467_s18 = sld [smem:[#allocation7 + $0x103]]  ;;  %s629_s21 = sshll.u32 %s720_s15, 4  ;;  %s630_s21 = int_to_ptr.vmem [resolvable:$false] %s629_s21 }
  0x54   : > { %v268_v23 = vmul.f32 %v453_v5, %v267_v20  ;;  %v271_v24 = vstv %s462_s28  ;;  %v255_v32 = vadd.f32 %v254_v22, %v251_v21  ;;  %p627_p13 = pnand %p626_p3, %p947_p7  ;;  %s631_s9 = scalar_lea.vmem %s630_s21, 192 }
  0x55   : > { %v265_v25 = vadd.f32 %v264_v19, %v261_v18  ;;  %v272_v26 = vmul.f32 %v454_v13, %v271_v24  ;;  %v275_v27 = vstv %s463_s10  ;;  %p632_p0 = scmp.lt.s32.totalorder %s880_s25, %s630_s21  ;;  %p633_p9 = scmp.lt.s32.totalorder %s631_s9, %s625_s8 }
  0x56   : > { %v276_v28 = vmul.f32 %v275_v27, %v231_v0  ;;  %v278_v29 = vstv %s464_s19  ;;  %p628_p4 = pneg %p627_p13 }
  0x57   : > { %v269_v30 = vadd.f32 %v268_v23, %v265_v25  ;;  %v281_v31 = vstv %s465_s11  ;;  %p634_p12 = por %p633_p9, %p632_p0 }
  0x58   : > { %v279_v33 = vadd.f32 %v278_v29, %v276_v28  ;;  %v282_v34 = vmul.f32 %v452_v1, %v281_v31  ;;  %v285_v35 = vstv %s466_s20 }
  0x59   : > { %v273_v36 = vadd.f32 %v272_v26, %v269_v30  ;;  %v286_v37 = vmul.f32 %v453_v5, %v285_v35  ;;  %v289_v38 = vstv %s467_s18  ;;  %p635_p2 = pnand %p634_p12, %p628_p4 }
  0x5a   : > { %v283_v39 = vadd.f32 %v282_v34, %v279_v33  ;;  %v290_v40 = vmul.f32 %v454_v13, %v289_v38 }
  0x5b   : > { %v292_v42 = vmax.f32 %v255_v32, %v273_v36 }
  0x5c   : > { %v287_v41 = vadd.f32 %v286_v37, %v283_v39 }
  0x5e   : > { %v291_v43 = vadd.f32 %v290_v40, %v287_v41 }
  0x60   : > { %v293_v44 = vmax.f32 %v292_v42, %v291_v43 }
  0x62   : > { %v294_v45 = vsub.f32 %v255_v32, %v293_v44  ;;  %v297_v46 = vsub.f32 %v273_v36, %v293_v44  ;;  %v300_v47 = vsub.f32 %v291_v43, %v293_v44 }
  0x64   : > { %v295_v48 = vmul.f32 1.442695, %v294_v45  ;;  %v298_v49 = vmul.f32 1.442695, %v297_v46  ;;  %v301_v50 = vmul.f32 1.442695, %v300_v47 }
  0x66   : > { %563 = vpow2.f32 %v295_v48 }
  0x67   : > { %565 = vpow2.f32 %v298_v49 }
  0x68   : > { %567 = vpow2.f32 %v301_v50 }
  0x73   : > { %v564_v51 = vpop.eup %563 }
  0x74   : > { %v566_v52 = vpop.eup %565 }
  0x75   : > { %v568_v53 = vpop.eup %567  ;;  %v303_v54 = vadd.f32 %v566_v52, %v564_v51 }
  0x77   : > { %v304_v55 = vadd.f32 %v568_v53, %v303_v54 }
  0x79   : > { %569 = vrcp.f32 %v304_v55 }
  0x86   : > { %v570_v56 = vpop.eup %569 }
  0x87   : > { %v307_v57 = vmul.f32 %v570_v56, %v564_v51  ;;  %v309_v58 = vmul.f32 %v570_v56, %v566_v52  ;;  %v312_v59 = vmul.f32 %v570_v56, %v568_v53 }
  0x89   : > { %308 = vst [vmem:[%s230_s26] sm:$0x3] %v307_v57  ;;  %468 = vst [vmem:[%s230_s26 + $0x2] sm:$0x3] %v309_v58 }
  0x8a   : > { %469 = vst [vmem:[%s230_s26 + $0x4] sm:$0x3] %v312_v59 }
  0x8b   : > { %638 = shalt.err (!%p635_p2)
}
  0x8c   : > { %s639_s28 = scalar_lea.hbm %s885_s6, 96  ;;  %s643_s11 = scalar_lea.hbm %s936_s3, 192 }
  0x8d   : > { %p640_p8 = scmp.ne.s32.totalorder %s885_s6, %s639_s28  ;;  %p644_p10 = scmp.lt.s32.totalorder %s885_s6, %s936_s3 }
  0x8e   : > { %p645_p11 = scmp.lt.s32.totalorder %s643_s11, %s639_s28 }
  0x8f   : > { %p641_p5 = pnand %p640_p8, %p947_p7 }
  0x90   : > { %p646_p1 = por %p645_p11, %p644_p10 }
  0x91   : > { %p642_p6 = pneg %p641_p5 }
  0x93   : > { %p647_p3 = pnand %p646_p1, %p642_p6 }
  0x95   : > { %650 = shalt.err (!%p647_p3)
}
  0x96   : > { %s721_s1 = smov 32   ;;  %s722_s26 = smov 2  }
  0x97   : > { %486 = dma.vmem_to_hbm [thread:$0]  (%p947_p7), %s880_s25, 96, %s885_s6, %s316_s7, %s721_s1, %s721_s1, %s722_s26  }
  0x98 PF: > { %s345_s29 = sand.u32 1, %s693_s12   ;;  %p948_p13 = scmp.ne.s32.totalorder %s942_s24, 0 }
  0x99   : > { %p949_p4 = scmp.ge.s32.totalorder %s713_s17, 2  ;;  %s346_s22 = scalar_lea.sflag [#allocation4], %s345_s29 }
  0x9b   : > { %p500_p0 = pnand %p949_p4, %p948_p13 }
  0x9d   : > { %p501_p9 = pneg %p500_p0 }
  0x9f   : > { %688 = dma.done.wait (%p501_p9), %s346_s22, 96  }
  0xa0   : > { %690 = vsyncadd (%p501_p9), %s346_s22, 4294967200  ;;  %s21_s17 = sadd.s32 1, %s713_s17   ;;  %s950_s12 = smov %s697_s13 }
  0xa1   : > { %p18_p12 = scmp.ge.s32.totalorder %s21_s17, 4   ;;  %s951_s13 = smov %s701_s14 }
  0xa2   : > { %s952_s14 = smov %s844_s30  ;;  %s953_s15 = smov %s709_s16 }
  0xa3   : > { %s954_s16 = smov %s956_s5  ;;  %20 = sbr.rel (!%p18_p12) target bundleno = 10 (0xa), region = 92 }
  0xa8   :  { %351 = vsyncpa [#allocation3], 1 }
  0xa9   :  { %353 = vsyncpa [#allocation3 + $0x1], 1 }
  0xaa   :  { %354 = vsyncpa [#allocation4], 1 }
  0xab   :  { %356 = vsyncpa [#allocation4 + $0x1], 1 }
  0xac   :  { %357 = vsyncpa [#allocation5], 1 }
  0xad   :  { %359 = vsyncpa [#allocation5 + $0x1], 1 }
  0xae   :  { %360 = vsyncpa [#allocation6], 1 }
  0xaf   :  { %362 = vsyncpa [#allocation6 + $0x1], 1 }

</bundles_post_ra>
